<compile_context>
chip_gen: v7x
topology: tpu7x:2x2x1
jax: 0.10.0
libtpu: 0.0.40
codegen_flags: <defaults>
</compile_context>

<pallas_src>
import functools

import jax
import jax.numpy as jnp
from jax.experimental import pallas as pl
from jax.experimental.pallas import tpu as pltpu

_BN_EPS = 1e-5
_LANE = 128
_VMEM_SPEC = pl.BlockSpec(memory_space=pltpu.MemorySpace.VMEM)


def _round_up(v, m):
    return ((v + m - 1) // m) * m


def _mlp_fused_kernel(num_hidden, n_batch, out_pads, x_ref, vec_ref, *refs):
    """Entire MLP forward in one kernel.

    refs layout: [w0, w1, ..., w_last, out_ref]
      w_i   : bf16 [C_in(_pad), C_out_pad]  (pre-transposed, output dim zero-padded)
      vec_ref: f32 [2*num_hidden + 1, C_max_pad]
               rows 2l / 2l+1 = gamma / beta of hidden layer l, last row = final bias.
    Activations stay resident in VMEM/vregs between layers.
    """
    out_ref = refs[-1]
    w_refs = refs[:-1]

    inv_n = 1.0 / float(n_batch)  # BN stats are over the FULL batch (N is not tiled).
    x = x_ref[...].astype(jnp.bfloat16)

    row = 0
    for li in range(num_hidden):
        c_out_pad = out_pads[li]
        w = w_refs[li][...]                                   # bf16 [c_prev, c_out_pad]
        gamma = vec_ref[row:row + 1, :c_out_pad]              # f32 [1, c_out_pad]
        beta = vec_ref[row + 1:row + 2, :c_out_pad]
        row += 2

        # Linear (hidden-layer bias omitted: exactly cancelled by BN mean subtraction).
        y = jnp.dot(x, w, preferred_element_type=jnp.float32)  # f32 [N, c_out_pad]

        # BatchNorm1d, batch statistics, single-pass sum / sum-of-squares.
        s1 = jnp.sum(y, axis=0, keepdims=True)
        s2 = jnp.sum(y * y, axis=0, keepdims=True)
        mean = s1 * inv_n
        var = jnp.maximum(s2 * inv_n - mean * mean, 0.0)       # clamp cancellation

        # Fold BN affine into one scale/shift (all on tiny (1,C) vectors), then a
        # single fused multiply-add + ReLU pass over the (N, C) tile.
        scale = gamma * jax.lax.rsqrt(var + _BN_EPS)
        shift = beta - mean * scale
        # relu_first=False -> ReLU after the norm.  dropout(p=0.0) is a no-op.
        x = jnp.maximum(y * scale + shift, 0.0).astype(jnp.bfloat16)

    w = w_refs[num_hidden][...]
    bias = vec_ref[row:row + 1, :out_pads[num_hidden]]
    out_ref[...] = jnp.dot(x, w, preferred_element_type=jnp.float32) + bias


class MLP:
    """JAX/Pallas port of torch_geometric MLP (batch_norm=True, relu_first=False, dropout=0)."""

    def __init__(self, channel_list, key):
        assert len(channel_list) >= 2
        self.channel_list = list(channel_list)
        self.num_hidden = len(channel_list) - 2

        # Original (PyTorch-layout) f32 parameters, kept for the pure-JAX reference.
        self.lins = []   # (W [out, in], b [1, out])
        self.norms = []  # (gamma [1, c], beta [1, c]) for hidden layers
        for c_in, c_out in zip(channel_list[:-1], channel_list[1:]):
            key, kw, kb = jax.random.split(key, 3)
            # Kaiming-uniform-like init (not bit-matching torch's a=sqrt(5) variant).
            bound_w = (3.0 / c_in) ** 0.5
            w = jax.random.uniform(kw, (c_out, c_in), jnp.float32, -bound_w, bound_w)
            bound_b = (1.0 / c_in) ** 0.5
            b = jax.random.uniform(kb, (1, c_out), jnp.float32, -bound_b, bound_b)
            self.lins.append((w, b))
        for c in channel_list[1:-1]:
            self.norms.append((jnp.ones((1, c), jnp.float32),
                               jnp.zeros((1, c), jnp.float32)))

        # Kernel-side parameters.
        #  - input dim of layer 0 stays native (x is passed unpadded);
        #  - every *output* dim zero-padded to a 128-lane multiple so all stores
        #    and subsequent matmul tiles are lane-dense.
        in_dims = [channel_list[0]] + [_round_up(c, _LANE) for c in channel_list[1:-1]]
        out_pads = [_round_up(c, _LANE) for c in channel_list[1:]]
        self._out_pads = tuple(out_pads)
        vec_width = max(out_pads)

        weights = []
        vecs = jnp.zeros((2 * self.num_hidden + 1, vec_width), jnp.float32)
        for li, ((w, b), c_in_k, c_out_p) in enumerate(zip(self.lins, in_dims, out_pads)):
            c_out, c_in = w.shape
            wt = jnp.zeros((c_in_k, c_out_p), jnp.float32).at[:c_in, :c_out].set(w.T)
            weights.append(wt.astype(jnp.bfloat16))   # bf16 MXU operands
            if li < self.num_hidden:
                gamma, beta = self.norms[li]
                vecs = vecs.at[2 * li, :c_out].set(gamma[0])
                vecs = vecs.at[2 * li + 1, :c_out].set(beta[0])
            else:
                vecs = vecs.at[2 * self.num_hidden, :c_out].set(b[0])
        self._weights = tuple(weights)
        self._vecs = vecs

        # Padded-lane invariant: padded gamma/beta/bias columns must be exactly
        # zero so padded activation lanes stay zero through every layer.
        for li, c in enumerate(channel_list[1:]):
            rows = (2 * li, 2 * li + 1) if li < self.num_hidden else (2 * self.num_hidden,)
            for r in rows:
                assert float(jnp.max(jnp.abs(vecs[r, c:]))) == 0.0 if c < vec_width else True

    @functools.partial(jax.jit, static_argnums=0)
    def __call__(self, x):
        n, c_in = x.shape
        assert c_in == self.channel_list[0]
        c_out = self.channel_list[-1]
        c_out_p = self._out_pads[-1]

        # NOTE: the batch dim is NOT tiled — BN statistics require the full batch.
        # TODO(synk): N-tiled variant (grid over N, weights resident, cross-tile
        # s1/s2 accumulation in scratch) before batches approach VMEM size,
        # especially on v7x (64 MiB physical VMEM).
        kernel = functools.partial(_mlp_fused_kernel, self.num_hidden, n, self._out_pads)
        out_p = pl.pallas_call(
            kernel,
            out_shape=jax.ShapeDtypeStruct((n, c_out_p), jnp.float32),
            in_specs=[_VMEM_SPEC] * (2 + len(self._weights)),
            out_specs=_VMEM_SPEC,
            compiler_params=pltpu.CompilerParams(
                # v5e's scoped default is only 16 MiB; stay well under 48 MiB for v7x.
                vmem_limit_bytes=32 * 1024 * 1024,
            ),
        )(x, self._vecs, *self._weights)
        return out_p[:, :c_out]


def _reference_forward(mlp, x, matmul_dtype=jnp.float32):
    """Pure-JAX reference (faithful torch semantics: hidden bias, two-pass var).

    matmul_dtype=bfloat16 mirrors the kernel's MXU operand precision (accumulation
    stays f32), giving a tight correctness check; float32 gives the exact torch math.
    """
    def mm(a, w):
        return jnp.dot(a.astype(matmul_dtype), w.T.astype(matmul_dtype),
                       preferred_element_type=jnp.float32)

    for (w, b), (gamma, beta) in zip(mlp.lins[:-1], mlp.norms):
        y = mm(x, w) + b
        mean = jnp.mean(y, axis=0, keepdims=True)
        var = jnp.mean((y - mean) ** 2, axis=0, keepdims=True)
        y = (y - mean) / jnp.sqrt(var + _BN_EPS) * gamma + beta
        x = jnp.maximum(y, 0.0)
    w, b = mlp.lins[-1]
    return mm(x, w) + b


if __name__ == "__main__":
    key = jax.random.PRNGKey(0)
    key, k_x, k_p = jax.random.split(key, 3)

    channel_list = [16, 32, 32, 8]   # 3-layer MLP: 16 -> 32 -> 32 -> 8
    n = 8                            # batch of 8 samples

    mlp = MLP(channel_list, k_p)
    x = jax.random.normal(k_x, (n, channel_list[0]), jnp.float32)

    out = mlp(x)
    jax.block_until_ready(out)
    assert out.shape == (n, channel_list[-1])

    # Tight check vs. a reference that mirrors the kernel's bf16 MXU operands.
    ref_bf16 = _reference_forward(mlp, x, matmul_dtype=jnp.bfloat16)
    assert jnp.allclose(out, ref_bf16, atol=2e-2, rtol=2e-2), \
        "Pallas output mismatch vs bf16-operand reference"

    # Loose sanity check vs. the pure-f32 torch-faithful math (only deviation is
    # bf16 rounding of the matmul operands).
    ref_f32 = _reference_forward(mlp, x, matmul_dtype=jnp.float32)
    assert jnp.allclose(out, ref_f32, atol=2.5e-1, rtol=2.5e-1), \
        "Pallas output mismatch vs f32 reference"

    print("KERNEL_OK")
</pallas_src>

<mosaic_0001>
module attributes {stable_mosaic.version = 11 : i64} {
  func.func @_mlp_fused_kernel(%arg0: memref<8x16xf32, #tpu.memory_space<vmem>>, %arg1: memref<5x128xf32, #tpu.memory_space<vmem>>, %arg2: memref<16x128xbf16, #tpu.memory_space<vmem>>, %arg3: memref<128x128xbf16, #tpu.memory_space<vmem>>, %arg4: memref<128x128xbf16, #tpu.memory_space<vmem>>, %arg5: memref<8x128xf32, #tpu.memory_space<vmem>>) attributes {dimension_semantics = [], scalar_prefetch = 0 : i64, scratch_operands = 0 : i64, tpu.core_type = #tpu.core_type<tc>} {
    %c0 = arith.constant 0 : index
    %c0_0 = arith.constant 0 : index
    %0 = vector.load %arg0[%c0, %c0_0] : memref<8x16xf32, #tpu.memory_space<vmem>>, vector<8x16xf32>
    %1 = arith.truncf %0 : vector<8x16xf32> to vector<8x16xbf16>
    %c0_1 = arith.constant 0 : index
    %c0_2 = arith.constant 0 : index
    %2 = vector.load %arg2[%c0_1, %c0_2] : memref<16x128xbf16, #tpu.memory_space<vmem>>, vector<16x128xbf16>
    %c0_3 = arith.constant 0 : index
    %c0_4 = arith.constant 0 : index
    %3 = vector.load %arg1[%c0_3, %c0_4] : memref<5x128xf32, #tpu.memory_space<vmem>>, vector<1x128xf32>
    %c1 = arith.constant 1 : index
    %c0_5 = arith.constant 0 : index
    %4 = vector.load %arg1[%c1, %c0_5] : memref<5x128xf32, #tpu.memory_space<vmem>>, vector<1x128xf32>
    %cst = arith.constant dense<0.000000e+00> : vector<8x128xf32>
    %5 = tpu.matmul %1, %2, %cst {dimension_numbers = #tpu.dot_dimension_numbers<[1], [0], [0], [1], [0, 0, 1, 1], [], []>} : vector<8x16xbf16>, vector<16x128xbf16>, vector<8x128xf32> -> vector<8x128xf32>
    %cst_6 = arith.constant dense<0.000000e+00> : vector<128xf32>
    %6 = vector.multi_reduction <add>, %5, %cst_6 [0] : vector<8x128xf32> to vector<128xf32>
    %7 = vector.shape_cast %6 : vector<128xf32> to vector<1x128xf32>
    %8 = arith.mulf %5, %5 : vector<8x128xf32>
    %cst_7 = arith.constant dense<0.000000e+00> : vector<128xf32>
    %9 = vector.multi_reduction <add>, %8, %cst_7 [0] : vector<8x128xf32> to vector<128xf32>
    %10 = vector.shape_cast %9 : vector<128xf32> to vector<1x128xf32>
    %cst_8 = arith.constant 1.250000e-01 : f32
    %11 = vector.broadcast %cst_8 : f32 to vector<1x128xf32>
    %12 = arith.mulf %7, %11 : vector<1x128xf32>
    %cst_9 = arith.constant 1.250000e-01 : f32
    %13 = vector.broadcast %cst_9 : f32 to vector<1x128xf32>
    %14 = arith.mulf %10, %13 : vector<1x128xf32>
    %15 = arith.mulf %12, %12 : vector<1x128xf32>
    %16 = arith.subf %14, %15 : vector<1x128xf32>
    %cst_10 = arith.constant 0.000000e+00 : f32
    %17 = vector.broadcast %cst_10 : f32 to vector<1x128xf32>
    %18 = arith.maximumf %16, %17 : vector<1x128xf32>
    %cst_11 = arith.constant 9.99999974E-6 : f32
    %19 = vector.broadcast %cst_11 : f32 to vector<1x128xf32>
    %20 = arith.addf %18, %19 : vector<1x128xf32>
    %21 = math.rsqrt %20 : vector<1x128xf32>
    %22 = arith.mulf %3, %21 : vector<1x128xf32>
    %23 = arith.mulf %12, %22 : vector<1x128xf32>
    %24 = arith.subf %4, %23 : vector<1x128xf32>
    %25 = vector.broadcast %22 : vector<1x128xf32> to vector<8x128xf32>
    %26 = arith.mulf %5, %25 : vector<8x128xf32>
    %27 = vector.broadcast %24 : vector<1x128xf32> to vector<8x128xf32>
    %28 = arith.addf %26, %27 : vector<8x128xf32>
    %cst_12 = arith.constant 0.000000e+00 : f32
    %29 = vector.broadcast %cst_12 : f32 to vector<8x128xf32>
    %30 = arith.maximumf %28, %29 : vector<8x128xf32>
    %31 = arith.truncf %30 : vector<8x128xf32> to vector<8x128xbf16>
    %c0_13 = arith.constant 0 : index
    %c0_14 = arith.constant 0 : index
    %32 = vector.load %arg3[%c0_13, %c0_14] : memref<128x128xbf16, #tpu.memory_space<vmem>>, vector<128x128xbf16>
    %c2 = arith.constant 2 : index
    %c0_15 = arith.constant 0 : index
    %33 = vector.load %arg1[%c2, %c0_15] : memref<5x128xf32, #tpu.memory_space<vmem>>, vector<1x128xf32>
    %c3 = arith.constant 3 : index
    %c0_16 = arith.constant 0 : index
    %34 = vector.load %arg1[%c3, %c0_16] : memref<5x128xf32, #tpu.memory_space<vmem>>, vector<1x128xf32>
    %cst_17 = arith.constant dense<0.000000e+00> : vector<8x128xf32>
    %35 = tpu.matmul %31, %32, %cst_17 {dimension_numbers = #tpu.dot_dimension_numbers<[1], [0], [0], [1], [0, 0, 1, 1], [], []>} : vector<8x128xbf16>, vector<128x128xbf16>, vector<8x128xf32> -> vector<8x128xf32>
    %cst_18 = arith.constant dense<0.000000e+00> : vector<128xf32>
    %36 = vector.multi_reduction <add>, %35, %cst_18 [0] : vector<8x128xf32> to vector<128xf32>
    %37 = vector.shape_cast %36 : vector<128xf32> to vector<1x128xf32>
    %38 = arith.mulf %35, %35 : vector<8x128xf32>
    %cst_19 = arith.constant dense<0.000000e+00> : vector<128xf32>
    %39 = vector.multi_reduction <add>, %38, %cst_19 [0] : vector<8x128xf32> to vector<128xf32>
    %40 = vector.shape_cast %39 : vector<128xf32> to vector<1x128xf32>
    %cst_20 = arith.constant 1.250000e-01 : f32
    %41 = vector.broadcast %cst_20 : f32 to vector<1x128xf32>
    %42 = arith.mulf %37, %41 : vector<1x128xf32>
    %cst_21 = arith.constant 1.250000e-01 : f32
    %43 = vector.broadcast %cst_21 : f32 to vector<1x128xf32>
    %44 = arith.mulf %40, %43 : vector<1x128xf32>
    %45 = arith.mulf %42, %42 : vector<1x128xf32>
    %46 = arith.subf %44, %45 : vector<1x128xf32>
    %cst_22 = arith.constant 0.000000e+00 : f32
    %47 = vector.broadcast %cst_22 : f32 to vector<1x128xf32>
    %48 = arith.maximumf %46, %47 : vector<1x128xf32>
    %cst_23 = arith.constant 9.99999974E-6 : f32
    %49 = vector.broadcast %cst_23 : f32 to vector<1x128xf32>
    %50 = arith.addf %48, %49 : vector<1x128xf32>
    %51 = math.rsqrt %50 : vector<1x128xf32>
    %52 = arith.mulf %33, %51 : vector<1x128xf32>
    %53 = arith.mulf %42, %52 : vector<1x128xf32>
    %54 = arith.subf %34, %53 : vector<1x128xf32>
    %55 = vector.broadcast %52 : vector<1x128xf32> to vector<8x128xf32>
    %56 = arith.mulf %35, %55 : vector<8x128xf32>
    %57 = vector.broadcast %54 : vector<1x128xf32> to vector<8x128xf32>
    %58 = arith.addf %56, %57 : vector<8x128xf32>
    %cst_24 = arith.constant 0.000000e+00 : f32
    %59 = vector.broadcast %cst_24 : f32 to vector<8x128xf32>
    %60 = arith.maximumf %58, %59 : vector<8x128xf32>
    %61 = arith.truncf %60 : vector<8x128xf32> to vector<8x128xbf16>
    %c0_25 = arith.constant 0 : index
    %c0_26 = arith.constant 0 : index
    %62 = vector.load %arg4[%c0_25, %c0_26] : memref<128x128xbf16, #tpu.memory_space<vmem>>, vector<128x128xbf16>
    %c4 = arith.constant 4 : index
    %c0_27 = arith.constant 0 : index
    %63 = vector.load %arg1[%c4, %c0_27] : memref<5x128xf32, #tpu.memory_space<vmem>>, vector<1x128xf32>
    %cst_28 = arith.constant dense<0.000000e+00> : vector<8x128xf32>
    %64 = tpu.matmul %61, %62, %cst_28 {dimension_numbers = #tpu.dot_dimension_numbers<[1], [0], [0], [1], [0, 0, 1, 1], [], []>} : vector<8x128xbf16>, vector<128x128xbf16>, vector<8x128xf32> -> vector<8x128xf32>
    %65 = vector.broadcast %63 : vector<1x128xf32> to vector<8x128xf32>
    %66 = arith.addf %64, %65 : vector<8x128xf32>
    %c0_29 = arith.constant 0 : index
    %c0_30 = arith.constant 0 : index
    %67 = vector.load %arg5[%c0_29, %c0_30] : memref<8x128xf32, #tpu.memory_space<vmem>>, vector<8x128xf32>
    tpu.vector_store %arg5[%c0_29, %c0_30], %66 {strides = array<i32>} : memref<8x128xf32, #tpu.memory_space<vmem>>, vector<8x128xf32>,
    return
  }
}

</mosaic_0001>

<bundles_post_ra>
// kernel: a_call__.1
= control target key start
LH: loop header
LB: loop body
LE: loop exit
PB: predicated region body
PF: predicated region fallthrough
CT: control target
= control target key end

     0   :  { %10 = vsyncpa [#allocation3], 0  ;;  %s751_s0 = inlined_call_operand.vmem [shape: f32[8,16], index: 0, kind: input, shape index: {}]   ;;  %s752_s1 = inlined_call_operand.hbm [shape: f32[5,128], index: 1, kind: input, shape index: {}]   ;;  %s753_s2 = inlined_call_operand.vmem [shape: bf16[16,128], index: 2, kind: input, shape index: {}]   ;;  %s754_s3 = inlined_call_operand.hbm [shape: bf16[128,128], index: 3, kind: input, shape index: {}]   ;;  %s755_s4 = inlined_call_operand.hbm [shape: bf16[128,128], index: 4, kind: input, shape index: {}]   ;;  %s756_s5 = inlined_call_operand.hbm [shape: f32[8,128], index: 5, kind: output, shape index: {}]  }
   0x1   :  { %11 = vsyncpa [#allocation6], 0 }
   0x2   :  { %12 = vsyncpa [#allocation4], 0  ;;  %s627_s18 = smov [#allocation5]   ;;  %s533_s22 = scalar_lea.hbm %s754_s3, 1024 }
   0x3   :  { %s32_s19 = sshll.u32 %s627_s18, 4  ;;  %p534_p0 = scmp.ne.s32.totalorder %s754_s3, %s533_s22  ;;  %s33_s19 = int_to_ptr.vmem [resolvable:$true] %s32_s19 }
   0x4   :  { %p537_p1 = scmp.lt.u32.totalorder %s533_s22, %s754_s3 }
   0x6   :  { %p539_p2 = pnand %p537_p1, %p534_p0 }
   0x8   :  { %542 = shalt.err (!%p539_p2)
}
   0x9   :  { %s543_s27 = scalar_lea.vmem %s33_s19, 1024  ;;  %p548_p4 = scmp.lt.s32.totalorder %s33_s19, %s33_s19 }
   0xa   :  { %p544_p3 = scmp.ne.s32.totalorder %s33_s19, %s543_s27  ;;  %p549_p5 = scmp.lt.s32.totalorder %s543_s27, %s543_s27 }
   0xc   :  { %p550_p6 = por %p549_p5, %p548_p4 }
   0xe   :  { %p551_p7 = pnand %p550_p6, %p544_p3 }
  0x10   :  { %554 = shalt.err (!%p551_p7)
}
  0x11   :  { %s628_s28 = smov 64   ;;  %s629_s29 = smov 4  }
  0x12   :  { %38 = dma.hbm_to_vmem [thread:$0]  %s754_s3, 1024, %s33_s19, [#allocation6], %s628_s28, %s628_s28, %s629_s29  }
  0x13   :  { %s630_s7 = smov [#allocation2]   ;;  %s631_s9 = smov [#allocation7]  }
  0x14   :  { %s21_s8 = sshll.u32 %s630_s7, 4  ;;  %s44_s10 = sshll.u32 %s631_s9, 4  ;;  %s22_s8 = int_to_ptr.vmem [resolvable:$true] %s21_s8  ;;  %s45_s10 = int_to_ptr.vmem [resolvable:$true] %s44_s10 }
  0x15   :  { %s555_s13 = scalar_lea.hbm %s752_s1, 128 }
  0x16   :  { %p556_p8 = scmp.ne.s32.totalorder %s752_s1, %s555_s13  ;;  %p559_p9 = scmp.lt.u32.totalorder %s555_s13, %s752_s1 }
  0x18   :  { %p561_p10 = pnand %p559_p9, %p556_p8 }
  0x1a   :  { %564 = shalt.err (!%p561_p10)
}
  0x1b   :  { %s565_s3 = scalar_lea.vmem %s22_s8, 128  ;;  %p570_p12 = scmp.lt.s32.totalorder %s22_s8, %s22_s8 }
  0x1c   :  { %p566_p11 = scmp.ne.s32.totalorder %s22_s8, %s565_s3  ;;  %p571_p13 = scmp.lt.s32.totalorder %s565_s3, %s565_s3 }
  0x1e   :  { %p572_p0 = por %p571_p13, %p570_p12 }
  0x20   :  { %p573_p1 = pnand %p572_p0, %p566_p11 }
  0x22   :  { %576 = shalt.err (!%p573_p1)
}
  0x23   :  { %24 = dma.hbm_to_vmem [thread:$0]  %s752_s1, 128, %s22_s8, [#allocation3]  }
  0x24   :  { %s577_s22 = scalar_lea.hbm %s755_s4, 1024 }
  0x25   :  { %p578_p2 = scmp.ne.s32.totalorder %s755_s4, %s577_s22  ;;  %p581_p3 = scmp.lt.u32.totalorder %s577_s22, %s755_s4 }
  0x27   :  { %p583_p4 = pnand %p581_p3, %p578_p2 }
  0x29   :  { %586 = shalt.err (!%p583_p4)
}
  0x2a   :  { %s587_s27 = scalar_lea.vmem %s45_s10, 1024  ;;  %p592_p6 = scmp.lt.s32.totalorder %s45_s10, %s45_s10 }
  0x2b   :  { %p588_p5 = scmp.ne.s32.totalorder %s45_s10, %s587_s27  ;;  %p593_p7 = scmp.lt.s32.totalorder %s587_s27, %s587_s27 }
  0x2d   :  { %p594_p8 = por %p593_p7, %p592_p6 }
  0x2f   :  { %p595_p9 = pnand %p594_p8, %p588_p5 }
  0x31   :  { %598 = shalt.err (!%p595_p9)
}
  0x32   :  { %50 = dma.hbm_to_vmem [thread:$0]  %s755_s4, 1024, %s45_s10, [#allocation6], %s628_s28, %s628_s28, %s629_s29  }
  0x33   :  { %621 = dma.done.wait [#allocation3], 128  }
  0x34   :  { %622 = vsyncadd [#allocation3], 4294967168 }
  0x35   :  { %623 = dma.done.wait [#allocation6], 2048  }
  0x36   :  { %624 = vsyncadd [#allocation6], 4294965248  ;;  %v632_v0 = vmov 0.0   ;;  %vm633_vm0 = vmmov 0   ;;  %v512_v1 = vld [vmem:[%s753_s2] sm:$0xff]   ;;  %vm73_vm1 = vcmask 130048   ;;  %v140_v35 = vlaneseq }
  0x37   :  { %458 = vmatprep.subr.bf16.mxu0 %v632_v0  ;;  %460 = vmatprep.mubr.msk.bf16.mxu0 %vm633_vm0, %v632_v0  ;;  %v61_v2 = vld [vmem:[%s751_s0] sm:$0xff]  ;;  %v513_v4 = vld [vmem:[#allocation5] sm:$0xff]   ;;  %v514_v5 = vld [vmem:[#allocation5 + $0x8] sm:$0xff]   ;;  %s634_s0 = smov [#allocation8]  }
  0x38   :  { %464 = vmatprep.subr.bf16.mxu1 %v632_v0  ;;  %480 = vmatprep.mubr.msk.bf16.mxu1 %vm633_vm0, %v632_v0  ;;  %v62_v3 = vpack.c.bf16 %v61_v2, %v61_v2  ;;  %v515_v6 = vld [vmem:[#allocation5 + $0x10] sm:$0xff]   ;;  %v516_v7 = vld [vmem:[#allocation5 + $0x18] sm:$0xff]   ;;  %v517_v8 = vld [vmem:[#allocation5 + $0x20] sm:$0xff]   ;;  %v141_v36 = vshrl.u32 %v140_v35, 7  ;;  %s409_s2 = sshll.u32 %s634_s0, 4  ;;  %s410_s2 = int_to_ptr.vmem [resolvable:$true] %s409_s2 }
  0x39   :  { %459 = vmatpush3.bf16.msra.mxu0 %v512_v1  ;;  %465 = vmatpush3.bf16.msra.mxu1 %v513_v4  ;;  %v518_v9 = vld [vmem:[#allocation5 + $0x28] sm:$0xff]   ;;  %v519_v10 = vld [vmem:[#allocation5 + $0x30] sm:$0xff]   ;;  %v520_v11 = vld [vmem:[#allocation5 + $0x38] sm:$0xff]   ;;  %s599_s28 = scalar_lea.vmem %s410_s2, 128  ;;  %p604_p11 = scmp.lt.s32.totalorder %s410_s2, %s410_s2 }
  0x3a   :  { %484 = vmatprep.subr.bf16.mxu0 %v632_v0  ;;  %466 = vmatprep.subr.bf16.mxu1 %v632_v0  ;;  %v65_v37 = vld [vmem:[#allocation2] sm:$0x1]  ;;  %v726_v38 = vsub.s32 0, %v141_v36  ;;  %v66_v41 = vld [vmem:[#allocation2 + $0x1] sm:$0x1]  ;;  %v521_v50 = vld [vmem:[#allocation7] sm:$0xff]   ;;  %p600_p10 = scmp.ne.s32.totalorder %s410_s2, %s599_s28  ;;  %p605_p12 = scmp.lt.s32.totalorder %s599_s28, %s599_s28 }
  0x3b   :  { %v522_v51 = vld [vmem:[#allocation7 + $0x8] sm:$0xff]   ;;  %v523_v52 = vld [vmem:[#allocation7 + $0x10] sm:$0xff]   ;;  %v524_v53 = vld [vmem:[#allocation7 + $0x18] sm:$0xff]  }
  0x3c   :  { %461 = vmatmul.mubr.msk.bf16.vlgmr.msra.gmra.mrb[0].mxu0 %vm73_vm1, %v62_v3  ;;  %v525_v54 = vld [vmem:[#allocation7 + $0x20] sm:$0xff]   ;;  %v526_v55 = vld [vmem:[#allocation7 + $0x28] sm:$0xff]   ;;  %v527_v56 = vld [vmem:[#allocation7 + $0x30] sm:$0xff]   ;;  %p606_p13 = por %p605_p12, %p604_p11 }
  0x3d   :  { %500 = vmatprep.mubr.msk.bf16.mxu0 %vm633_vm0, %v632_v0  ;;  %467 = vmatpush3.bf16.msra.mxu1 %v514_v5  ;;  %v528_v57 = vld [vmem:[#allocation7 + $0x38] sm:$0xff]  }
  0x3e   :  { %468 = vmatprep.subr.bf16.mxu1 %v632_v0  ;;  %485 = vmatpush3.bf16.msra.mxu0 %v521_v50  ;;  %p607_p0 = pnand %p606_p13, %p600_p10 }
  0x3f   :  { %486 = vmatprep.subr.bf16.mxu0 %v632_v0 }
  0x41   :  { %469 = vmatpush3.bf16.msra.mxu1 %v515_v6 }
  0x42   :  { %470 = vmatprep.subr.bf16.mxu1 %v632_v0  ;;  %487 = vmatpush3.bf16.msra.mxu0 %v522_v51 }
  0x43   :  { %488 = vmatprep.subr.bf16.mxu0 %v632_v0 }
  0x45   :  { %471 = vmatpush3.bf16.msra.mxu1 %v516_v7 }
  0x46   :  { %472 = vmatprep.subr.bf16.mxu1 %v632_v0  ;;  %489 = vmatpush3.bf16.msra.mxu0 %v523_v52 }
  0x47   :  { %490 = vmatprep.subr.bf16.mxu0 %v632_v0 }
  0x49   :  { %473 = vmatpush3.bf16.msra.mxu1 %v517_v8 }
  0x4a   :  { %474 = vmatprep.subr.bf16.mxu1 %v632_v0  ;;  %491 = vmatpush3.bf16.msra.mxu0 %v524_v53 }
  0x4b   :  { %492 = vmatprep.subr.bf16.mxu0 %v632_v0 }
  0x4d   :  { %475 = vmatpush3.bf16.msra.mxu1 %v518_v9 }
  0x4e   :  { %476 = vmatprep.subr.bf16.mxu1 %v632_v0  ;;  %493 = vmatpush3.bf16.msra.mxu0 %v525_v54 }
  0x4f   :  { %494 = vmatprep.subr.bf16.mxu0 %v632_v0 }
  0x51   :  { %477 = vmatpush3.bf16.msra.mxu1 %v519_v10 }
  0x52   :  { %478 = vmatprep.subr.bf16.mxu1 %v632_v0  ;;  %495 = vmatpush3.bf16.msra.mxu0 %v526_v55 }
  0x53   :  { %496 = vmatprep.subr.bf16.mxu0 %v632_v0 }
  0x55   :  { %479 = vmatpush3.bf16.msra.mxu1 %v520_v11 }
  0x56   :  { %497 = vmatpush3.bf16.msra.mxu0 %v527_v56 }
  0x57   :  { %498 = vmatprep.subr.bf16.mxu0 %v632_v0 }
  0x5a   :  { %499 = vmatpush3.bf16.msra.mxu0 %v528_v57 }
 0x10f   :  { %v111_v12 = vpop.f32.mrb[0].mxu0 }
 0x110   :  { %v117_v13 = vrot.slane %v111_v12, 4  ;;  %v123_v14 = vmul.f32 %v111_v12, %v111_v12  ;;  %v462_v15 = vpop.f32.mrb[1].mxu0 }
 0x111   :  { %v114_v16 = vpop.f32.mrb[2].mxu0 }
 0x112   :  { %v118_v17 = vadd.f32 %v117_v13, %v111_v12  ;;  %v124_v18 = vrot.slane %v123_v14, 4  ;;  %v463_v19 = vpop.f32.mrb[3].mxu0 }
 0x114   :  { %v119_v20 = vrot.slane %v118_v17, 2  ;;  %v125_v21 = vadd.f32 %v124_v18, %v123_v14 }
 0x116   :  { %v120_v22 = vadd.f32 %v119_v20, %v118_v17  ;;  %v126_v23 = vrot.slane %v125_v21, 2  ;;  %v168_v17 = vld [vmem:[#allocation2 + $0x2] sm:$0x1]  ;;  %v169_v20 = vld [vmem:[#allocation2 + $0x3] sm:$0x1] }
 0x118   :  { %v121_v24 = vrot.slane %v120_v22, 1  ;;  %v127_v25 = vadd.f32 %v126_v23, %v125_v21 }
 0x11a   :  { %v122_v26 = vadd.f32 %v121_v24, %v120_v22  ;;  %v128_v27 = vrot.slane %v127_v25, 1 }
 0x11c   :  { %v129_v28 = vadd.f32 %v128_v27, %v127_v25  ;;  %v130_v29 = vmul.f32 0.125, %v122_v26 }
 0x11e   :  { %v131_v30 = vmul.f32 0.125, %v129_v28  ;;  %v132_v31 = vmul.f32 %v130_v29, %v130_v29 }
 0x120   :  { %v133_v32 = vsub.f32 %v131_v30, %v132_v31 }
 0x122   :  { %v134_v33 = vmax.f32 %v133_v32, 0.0 }
 0x124   :  { %v135_v34 = vadd.f32 1e-05, %v134_v33 }
 0x126   :  { %529 = vrsqrt.f32 %v135_v34 }
 0x130   :  { %v530_v39 = vpop.eup %529 }
 0x131   :  { %v137_v40 = vmul.f32 %v530_v39, %v65_v37 }
 0x133   :  { %v143_v42 = vrot.slane %v137_v40, %v726_v38  ;;  %v138_v43 = vmul.f32 %v137_v40, %v130_v29  ;;  %v429_v29 = vld [vmem:[#allocation2 + $0x4] ss:$0 sm:$0xff] }
 0x135   :  { %v139_v44 = vsub.f32 %v66_v41, %v138_v43  ;;  %v144_v45 = vmul.f32 %v143_v42, %v111_v12 }
 0x137   :  { %v148_v46 = vrot.slane %v139_v44, %v726_v38 }
 0x139   :  { %v149_v47 = vadd.f32 %v148_v46, %v144_v45 }
 0x13b   :  { %v150_v48 = vmax.f32 %v149_v47, 0.0 }
 0x13d   :  { %v151_v49 = vpack.c.bf16 %v150_v48, %v150_v48 }
 0x13f   :  { %481 = vmatmul.mubr.bf16.vlgmr.msra.gmra.mrb[0].mxu1 %v151_v49 }
 0x212   :  { %v252_v58 = vpop.f32.mrb[0].mxu1 }
 0x213   :  { %v258_v59 = vrot.slane %v252_v58, 4  ;;  %v264_v60 = vmul.f32 %v252_v58, %v252_v58  ;;  %v482_v61 = vpop.f32.mrb[1].mxu1 }
 0x214   :  { %v255_v62 = vpop.f32.mrb[2].mxu1 }
 0x215   :  { %v259_v63 = vadd.f32 %v258_v59, %v252_v58  ;;  %v265_v1 = vrot.slane %v264_v60, 4  ;;  %v483_v2 = vpop.f32.mrb[3].mxu1 }
 0x217   :  { %v260_v3 = vrot.slane %v259_v63, 2  ;;  %v266_v4 = vadd.f32 %v265_v1, %v264_v60 }
 0x219   :  { %v261_v5 = vadd.f32 %v260_v3, %v259_v63  ;;  %v267_v6 = vrot.slane %v266_v4, 2 }
 0x21b   :  { %v262_v7 = vrot.slane %v261_v5, 1  ;;  %v268_v8 = vadd.f32 %v267_v6, %v266_v4 }
 0x21d   :  { %v263_v9 = vadd.f32 %v262_v7, %v261_v5  ;;  %v269_v10 = vrot.slane %v268_v8, 1 }
 0x21f   :  { %v270_v11 = vadd.f32 %v269_v10, %v268_v8  ;;  %v271_v0 = vmul.f32 0.125, %v263_v9 }
 0x221   :  { %v272_v12 = vmul.f32 0.125, %v270_v11  ;;  %v273_v13 = vmul.f32 %v271_v0, %v271_v0 }
 0x223   :  { %v274_v14 = vsub.f32 %v272_v12, %v273_v13 }
 0x225   :  { %v275_v15 = vmax.f32 %v274_v14, 0.0 }
 0x227   :  { %v276_v16 = vadd.f32 1e-05, %v275_v15 }
 0x229   :  { %531 = vrsqrt.f32 %v276_v16 }
 0x233   :  { %v532_v18 = vpop.eup %531 }
 0x234   :  { %v278_v19 = vmul.f32 %v532_v18, %v168_v17 }
 0x236   :  { %v279_v21 = vmul.f32 %v278_v19, %v271_v0  ;;  %v284_v22 = vrot.slane %v278_v19, %v726_v38 }
 0x238   :  { %v280_v23 = vsub.f32 %v169_v20, %v279_v21  ;;  %v285_v24 = vmul.f32 %v284_v22, %v252_v58 }
 0x23a   :  { %v289_v25 = vrot.slane %v280_v23, %v726_v38 }
 0x23c   :  { %v290_v26 = vadd.f32 %v289_v25, %v285_v24 }
 0x23e   :  { %v291_v27 = vmax.f32 %v290_v26, 0.0 }
 0x240   :  { %v292_v28 = vpack.c.bf16 %v291_v27, %v291_v27 }
 0x242   :  { %501 = vmatmul.mubr.bf16.vlgmr.msra.gmra.mrb[4].mxu0 %v292_v28 }
 0x315   :  { %v396_v30 = vpop.f32.mrb[4].mxu0 }
 0x316   :  { %v397_v31 = vadd.f32 %v429_v29, %v396_v30  ;;  %v502_v32 = vpop.f32.mrb[5].mxu0 }
 0x317   :  { %v399_v33 = vpop.f32.mrb[6].mxu0 }
 0x318   :  { %402 = vst [vmem:[#allocation8] sm:$0xff] %v397_v31  ;;  %v503_v34 = vpop.f32.mrb[7].mxu0 }
 0x319   :  { %610 = shalt.err (!%p607_p0)
}
 0x31a   :  { %s611_s10 = scalar_lea.hbm %s756_s5, 128 }
 0x31b   :  { %p612_p1 = scmp.ne.s32.totalorder %s756_s5, %s611_s10  ;;  %p615_p2 = scmp.lt.u32.totalorder %s611_s10, %s756_s5 }
 0x31d   :  { %p617_p3 = pnand %p615_p2, %p612_p1 }
 0x31f   :  { %620 = shalt.err (!%p617_p3)
}
 0x320   :  { %412 = dma.vmem_to_hbm [thread:$0]  %s410_s2, 128, %s756_s5, [#allocation4]  }
 0x321   :  { %625 = dma.done.wait [#allocation4], 128  }
 0x322   :  { %626 = vsyncadd [#allocation4], 4294967168 }
 0x323   :  { %416 = vsyncpa [#allocation3], 1 }
 0x324   :  { %417 = vsyncpa [#allocation6], 1 }
 0x325   :  { %418 = vsyncpa [#allocation4], 1 }

</bundles_post_ra>
